<compile_context>
chip_gen: v5e
topology: v5e:2x2
jax: 0.10.0
libtpu: 0.0.40
codegen_flags: <defaults>
</compile_context>

<pallas_src>
import jax
import jax.numpy as jnp
from jax.experimental import pallas as pl
from jax.experimental.pallas import tpu as pltpu


def _round_up(x, m):
    return ((x + m - 1) // m) * m


def _vmem_capacity_bytes():
    # Generation-aware VMEM (v5e/v6e: 128 MiB, v7x: 64 MiB per TensorCore).
    try:
        return int(pltpu.get_tpu_info().vmem_capacity_bytes)
    except Exception:
        return 64 << 20  # conservative default (v7x)


def _largest_divisor_multiple(n, unit, cap):
    """Largest divisor of n that is a multiple of `unit` and <= cap."""
    best = unit
    d = unit
    hi = min(cap, n)
    while d <= hi:
        if n % d == 0:
            best = d
        d += unit
    return best


def _pick_tile_m(M, cap):
    """Pick an M tile. Prefer exact (divisor of M, 8-aligned, <= cap) so the
    epilogue slice is free, and >=2 blocks so both v7x TensorCores get work."""
    cap = max(8, (cap // 8) * 8)
    divs = [d for d in range(8, min(cap, M) + 1, 8) if M % d == 0]
    if divs:
        multi = [d for d in divs if M // d >= 2]
        tile_m = max(multi) if multi else max(divs)
        return tile_m, M
    # No exact 8-aligned divisor: pad M, aiming for >= 2 tiles when possible.
    n_tiles = max(2, -(-M // cap))
    tile_m = min(cap, max(8, _round_up(-(-M // n_tiles), 8)))
    return tile_m, _round_up(M, tile_m)


def _patch_embed_kernel(xp_ref, w_ref, b_ref, o_ref):
    # xp_ref: (TM, K)  w_ref: (K, TE)  b_ref: (1, TE) f32  o_ref: (TM, TE)
    acc = jnp.dot(xp_ref[...], w_ref[...], preferred_element_type=jnp.float32)
    o_ref[...] = (acc + b_ref[...]).astype(o_ref.dtype)


def patch_embed_matmul(x_patches, w_mat, bias_row, *, out_dtype, tile_m, tile_e):
    """(M, K) @ (K, E) + bias -> (M, E). Requires M % tile_m == 0, E % tile_e == 0."""
    M, K = x_patches.shape
    K2, E = w_mat.shape
    assert K == K2 and bias_row.shape == (1, E)
    assert M % tile_m == 0 and E % tile_e == 0

    grid_m, grid_e = M // tile_m, E // tile_e
    bytes_in = jnp.dtype(x_patches.dtype).itemsize
    bytes_out = jnp.dtype(out_dtype).itemsize

    if grid_e == 1:
        # Whole weight resident in VMEM: W / bias block index is constant over
        # the entire grid -> one DMA, never re-fetched.
        grid = (grid_m,)
        xp_spec = pl.BlockSpec((tile_m, K), lambda i: (i, 0))
        w_spec = pl.BlockSpec((K, tile_e), lambda i: (0, 0))
        b_spec = pl.BlockSpec((1, tile_e), lambda i: (0, 0))
        o_spec = pl.BlockSpec((tile_m, tile_e), lambda i: (i, 0))
        semantics = ("parallel",)
        w_reads, xp_reads = 1, 1
    else:
        # E must be tiled: order the grid so the operand indexed by the outer
        # axis stays resident across the inner sweep and only the cheaper
        # stream is re-read.
        redundant_w = (grid_m - 1) * K * E      # E innermost: W re-read per M tile
        redundant_xp = (grid_e - 1) * M * K     # M innermost: xp re-read per E tile
        if redundant_w <= redundant_xp:
            grid = (grid_m, grid_e)             # E innermost
            xp_spec = pl.BlockSpec((tile_m, K), lambda i, j: (i, 0))
            w_spec = pl.BlockSpec((K, tile_e), lambda i, j: (0, j))
            b_spec = pl.BlockSpec((1, tile_e), lambda i, j: (0, j))
            o_spec = pl.BlockSpec((tile_m, tile_e), lambda i, j: (i, j))
            w_reads, xp_reads = grid_m, 1
        else:
            grid = (grid_e, grid_m)             # M innermost
            xp_spec = pl.BlockSpec((tile_m, K), lambda j, i: (i, 0))
            w_spec = pl.BlockSpec((K, tile_e), lambda j, i: (0, j))
            b_spec = pl.BlockSpec((1, tile_e), lambda j, i: (0, j))
            o_spec = pl.BlockSpec((tile_m, tile_e), lambda j, i: (i, j))
            w_reads, xp_reads = 1, grid_e
        semantics = ("parallel", "parallel")

    vmem_cap = _vmem_capacity_bytes()
    vmem_need = (2 * tile_m * (K * bytes_in + tile_e * bytes_out)
                 + 2 * (K * tile_e * bytes_in + tile_e * 4))
    vmem_limit = min(max(vmem_need + (4 << 20), 16 << 20), int(vmem_cap * 0.75))
    vmem_limit = max(vmem_limit, vmem_need + (1 << 20))

    cost = pl.CostEstimate(
        flops=2 * M * K * E,
        transcendentals=0,
        bytes_accessed=(bytes_in * (xp_reads * M * K + w_reads * K * E)
                        + 4 * E + bytes_out * M * E),
    )

    return pl.pallas_call(
        _patch_embed_kernel,
        out_shape=jax.ShapeDtypeStruct((M, E), out_dtype),
        grid=grid,
        in_specs=[xp_spec, w_spec, b_spec],
        out_specs=o_spec,
        compiler_params=pltpu.CompilerParams(
            dimension_semantics=semantics,
            vmem_limit_bytes=vmem_limit,
        ),
        cost_estimate=cost,
    )(x_patches, w_mat, bias_row)


def patch_embed_forward(x, weight, bias, patch_size, *,
                        compute_dtype=jnp.float32, out_dtype=None):
    """x: (B, C, H, W) NCHW; weight: (E, C, ph, pw) OIHW; bias: (E,).

    Equivalent to torch: proj(x).flatten(2).transpose(1, 2) -> (B, N, E).
    compute_dtype=jnp.bfloat16 feeds the MXU bf16 operands (f32 accumulation);
    out_dtype (default x.dtype) lets the kernel emit the downstream
    activation width directly, halving the largest HBM stream when bf16.
    """
    B, C, H, W = x.shape
    E = weight.shape[0]
    ph = pw = patch_size
    assert H % ph == 0 and W % pw == 0
    gh, gw = H // ph, W // pw
    N = gh * gw
    M, K = B * N, C * ph * pw
    out_dtype = x.dtype if out_dtype is None else out_dtype

    bytes_in = jnp.dtype(compute_dtype).itemsize
    bytes_out = jnp.dtype(out_dtype).itemsize

    # --- patch extraction (XLA glue) -------------------------------------
    # Cast first so the materialized (M, K) intermediate and the transpose's
    # write/read round trip run at the compute width, not f32.
    # TODO(synk): fuse the extraction entirely (NHWC-native input + permuted
    # weight, allow_input_fusion, or an in-kernel (B,gh)-indexed BlockSpec)
    # to drop this full-activation HBM shuffle.
    xc = x.astype(compute_dtype)
    xp = (xc.reshape(B, C, gh, ph, gw, pw)
            .transpose(0, 2, 4, 1, 3, 5)
            .reshape(M, K))
    w_mat = weight.reshape(E, K).T.astype(compute_dtype)      # (K, E)

    # --- padding ----------------------------------------------------------
    # K: both blocks span the full contraction dim, so only sublane alignment
    #    is required (8 for 32-bit, 16 for 16-bit operands), not 128.
    # E: pad to 128 for unmasked lane-dense output stores (standard ViT widths
    #    768/1024/1280 are already exact -> no pad, free epilogue).
    sublane = 16 if bytes_in == 2 else 8
    K_pad = _round_up(K, sublane)
    E_pad = _round_up(E, 128)

    vmem_cap = _vmem_capacity_bytes()
    budget = int(vmem_cap * 0.6)            # leave room for Mosaic scratch

    # Keep the whole weight resident whenever its double-buffer fits a quarter
    # of the budget (true for every standard ViT); otherwise tile E.
    w_dbuf = 2 * (K_pad * E_pad * bytes_in + E_pad * 4)
    if w_dbuf <= budget // 4:
        tile_e = E_pad
    else:
        e_cap = max(128, (budget // 4) // (2 * K_pad * bytes_in))
        tile_e = _largest_divisor_multiple(E_pad, 128, e_cap)
        w_dbuf = 2 * (K_pad * tile_e * bytes_in + tile_e * 4)

    # M tile: as large as the remaining budget allows (fewer grid steps, better
    # DMA efficiency), capped generation-aware, exact divisor of M if possible.
    per_row = 2 * (K_pad * bytes_in + tile_e * bytes_out)
    cap = max(8, (budget - w_dbuf) // per_row)
    cap = min(cap, 2048 if vmem_cap >= (100 << 20) else 1024)
    tile_m, M_pad = _pick_tile_m(M, cap)

    xp_p = xp if (M_pad == M and K_pad == K) else jnp.pad(
        xp, ((0, M_pad - M), (0, K_pad - K)))
    w_p = w_mat if (K_pad == K and E_pad == E) else jnp.pad(
        w_mat, ((0, K_pad - K), (0, E_pad - E)))
    b_p = jnp.pad(bias, (0, E_pad - E)).reshape(1, E_pad).astype(jnp.float32)

    out_p = patch_embed_matmul(xp_p, w_p, b_p, out_dtype=out_dtype,
                               tile_m=tile_m, tile_e=tile_e)
    out = out_p if (M_pad == M and E_pad == E) else out_p[:M, :E]
    return out.reshape(B, N, E)


if __name__ == "__main__":
    # Small shapes consistent with the module: img_size=16, patch_size=4,
    # in_chans=4, embed_dim=32, batch=2 -> num_patches = (16/4)^2 = 16.
    B, C, H, W = 2, 4, 16, 16
    patch_size = 4
    embed_dim = 32

    key = jax.random.PRNGKey(0)
    kx, kw, kb = jax.random.split(key, 3)
    x = jax.random.normal(kx, (B, C, H, W), dtype=jnp.float32)
    weight = 0.02 * jax.random.normal(
        kw, (embed_dim, C, patch_size, patch_size), dtype=jnp.float32)
    bias = 0.02 * jax.random.normal(kb, (embed_dim,), dtype=jnp.float32)

    # Reference: plain JAX conv2d (NCHW / OIHW), flatten(2).transpose(1,2).
    ref = jax.lax.conv_general_dilated(
        x, weight, window_strides=(patch_size, patch_size), padding="VALID",
        dimension_numbers=("NCHW", "OIHW", "NCHW"))
    ref = ref + bias[None, :, None, None]
    ref = ref.reshape(B, embed_dim, -1).transpose(0, 2, 1)

    # f32 path (exact semantics of the torch module; tight tolerance).
    out = patch_embed_forward(x, weight, bias, patch_size)
    out = jax.block_until_ready(out)
    assert out.shape == (B, (H // patch_size) * (W // patch_size), embed_dim)
    assert jnp.allclose(out, ref, atol=1e-5, rtol=1e-5)

    # bf16 operands + bf16 output — the MXU/HBM-efficient route on v5e/v6e/v7x.
    out_bf16 = patch_embed_forward(x, weight, bias, patch_size,
                                   compute_dtype=jnp.bfloat16,
                                   out_dtype=jnp.bfloat16)
    out_bf16 = jax.block_until_ready(out_bf16)
    assert out_bf16.dtype == jnp.bfloat16
    assert jnp.allclose(out_bf16.astype(jnp.float32), ref, atol=2e-2, rtol=2e-2)

    print("KERNEL_OK")
</pallas_src>

<mosaic_0001>
module attributes {stable_mosaic.version = 11 : i64} {
  func.func @_patch_embed_kernel(%arg0: i32, %arg1: memref<16x64xf32, #tpu.memory_space<vmem>>, %arg2: memref<64x128xf32, #tpu.memory_space<vmem>>, %arg3: memref<1x128xf32, #tpu.memory_space<vmem>>, %arg4: memref<16x128xf32, #tpu.memory_space<vmem>>) attributes {dimension_semantics = [#tpu.dimension_semantics<parallel>], iteration_bounds = array<i64: 2>, scalar_prefetch = 0 : i64, scratch_operands = 0 : i64, tpu.core_type = #tpu.core_type<tc>, window_params = [{transform_indices = @transform_0, window_bounds = array<i64: 16, 64>}, {pipeline_mode = #tpu.pipeline_mode<synchronous>, transform_indices = @transform_1, window_bounds = array<i64: 64, 128>}, {pipeline_mode = #tpu.pipeline_mode<synchronous>, transform_indices = @transform_2, window_bounds = array<i64: 1, 128>}, {transform_indices = @transform_3, window_bounds = array<i64: 16, 128>}]} {
    %c0 = arith.constant 0 : index
    %c0_0 = arith.constant 0 : index
    %0 = vector.load %arg1[%c0, %c0_0] : memref<16x64xf32, #tpu.memory_space<vmem>>, vector<16x64xf32>
    %c0_1 = arith.constant 0 : index
    %c0_2 = arith.constant 0 : index
    %1 = vector.load %arg2[%c0_1, %c0_2] : memref<64x128xf32, #tpu.memory_space<vmem>>, vector<64x128xf32>
    %cst = arith.constant dense<0.000000e+00> : vector<16x128xf32>
    %2 = tpu.matmul %0, %1, %cst {dimension_numbers = #tpu.dot_dimension_numbers<[1], [0], [0], [1], [0, 0, 1, 1], [], []>} : vector<16x64xf32>, vector<64x128xf32>, vector<16x128xf32> -> vector<16x128xf32>
    %c0_3 = arith.constant 0 : index
    %c0_4 = arith.constant 0 : index
    %3 = vector.load %arg3[%c0_3, %c0_4] : memref<1x128xf32, #tpu.memory_space<vmem>>, vector<1x128xf32>
    %4 = vector.broadcast %3 : vector<1x128xf32> to vector<16x128xf32>
    %5 = arith.addf %2, %4 : vector<16x128xf32>
    %c0_5 = arith.constant 0 : index
    %c0_6 = arith.constant 0 : index
    %6 = vector.load %arg4[%c0_5, %c0_6] : memref<16x128xf32, #tpu.memory_space<vmem>>, vector<16x128xf32>
    tpu.vector_store %arg4[%c0_5, %c0_6], %5 {strides = array<i32>} : memref<16x128xf32, #tpu.memory_space<vmem>>, vector<16x128xf32>,
    return
  }
  func.func @transform_0(%arg0: i32) -> (i32, i32) {
    %c0_i32 = arith.constant 0 : i32
    %c0_i32_0 = arith.constant 0 : i32
    return %arg0, %c0_i32 : i32, i32
  }
  func.func @transform_1(%arg0: i32) -> (i32, i32) {
    %c0_i32 = arith.constant 0 : i32
    %c0_i32_0 = arith.constant 0 : i32
    %c0_i32_1 = arith.constant 0 : i32
    return %c0_i32, %c0_i32_0 : i32, i32
  }
  func.func @transform_2(%arg0: i32) -> (i32, i32) {
    %c0_i32 = arith.constant 0 : i32
    %c0_i32_0 = arith.constant 0 : i32
    %c0_i32_1 = arith.constant 0 : i32
    return %c0_i32, %c0_i32_0 : i32, i32
  }
  func.func @transform_3(%arg0: i32) -> (i32, i32) {
    %c0_i32 = arith.constant 0 : i32
    %c0_i32_0 = arith.constant 0 : i32
    return %arg0, %c0_i32 : i32, i32
  }
}

</mosaic_0001>

<bundles_post_ra>
// kernel: tpu_custom_call.1
= control target key start
LH: loop header
LB: loop body
LE: loop exit
PB: predicated region body
PF: predicated region fallthrough
CT: control target
= control target key end

     0   :  { %8 = vsyncpa [#allocation3], 0  ;;  %s753_s0 = inlined_call_operand.hbm [shape: f32[32,64], index: 0, kind: input, shape index: {}]   ;;  %s754_s1 = inlined_call_operand.hbm [shape: f32[64,128], index: 1, kind: input, shape index: {}]   ;;  %s755_s2 = inlined_call_operand.vmem [shape: f32[1,128], index: 2, kind: input, shape index: {}]   ;;  %s756_s3 = inlined_call_operand.hbm [shape: f32[32,128], index: 3, kind: output, shape index: {}]  }
   0x1   :  { %10 = vsyncpa [#allocation3 + $0x1], 0 }
   0x2   :  { %11 = vsyncpa [#allocation6], 0 }
   0x3   :  { %12 = vsyncpa [#allocation4], 0 }
   0x4   :  { %14 = vsyncpa [#allocation4 + $0x1], 0  ;;  %s602_s12 = smov 0   ;;  %s604_s13 = smov 0  }
   0x5   :  { %s606_s14 = smov 0   ;;  %s608_s15 = smov 0  }
   0x6 LB: > { %s623_s16 = sadd.s32 4294967295, %s575_s15   ;;  %s355_s17 = sadd.s32 4294967294, %s575_s15   ;;  %s575_s15 = sphi %s608_s15, %s766_s15   ;;  %s571_s14 = sphi %s606_s14, %s765_s14   ;;  %s567_s13 = sphi %s604_s13, %s764_s13   ;;  %s563_s12 = sphi %s602_s12, %s763_s12  }
   0x7   : > { %p40_p0 = scmp.ne.s32.totalorder %s567_s13, %s563_s12  ;;  %p41_p1 = scmp.eq.s32.totalorder %s623_s16, 0 }
   0x8   : > { %p106_p2 = scmp.eq.s32.totalorder %s623_s16, 1  ;;  %p112_p3 = scmp.eq.s32.totalorder %s355_s17, 1 }
   0x9   : > { %p632_p4 = por %p41_p1, %p40_p0  ;;  %p356_p5 = scmp.ge.s32.totalorder %s575_s15, 1 }
   0xa   : > { %p637_p6 = por %p112_p3, %p40_p0  ;;  %p119_p7 = scmp.lt.s32.totalorder %s575_s15, 3 }
   0xb   : > { %s130_s22 = sshll.u32 %s754_s1, 4  ;;  %s577_s24 = smov [#allocation5]   ;;  %s131_s22 = int_to_ptr.hbm [resolvable:$true] %s130_s22 }
   0xc   : > { %p645_p8 = pnand %p356_p5, %p119_p7  ;;  %s132_s25 = sshll.u32 %s577_s24, 4  ;;  %s133_s25 = int_to_ptr.vmem [resolvable:$true] %s132_s25 }
   0xd   : > { %s655_s26 = sadd.s32 1, %s575_s15   ;;  %s578_s27 = smov 128  }
   0xe   : > { %p391_p9 = pneg %p645_p8  ;;  %s579_s28 = smov 8  }
   0xf   : > { %s24_s29 = ssub.s32 %s575_s15, %s655_s26  ;;  %s27_s30 = sadd.s32 1, %s571_s14 }
  0x10   : > { %p392_p10 = pnand %p391_p9, %p41_p1  ;;  %p25_p12 = scmp.eq.s32.totalorder %s24_s29, 0 }
  0x11   : > { %p34_p13 = scmp.ne.s32.totalorder %s571_s14, %s567_s13  ;;  %p35_p0 = scmp.eq.s32.totalorder %s575_s15, 0 }
  0x12   : > { %394 = dma.hbm_to_vmem [thread:$0]  (!%p392_p10), %s131_s22, 1024, %s133_s25, [#allocation6], %s578_s27, %s578_s27, %s579_s28  }
  0x13   : > { %s667_s4 = scalar_select %p25_p12, %s571_s14, %s27_s30  }
  0x14   : > { %p671_p3 = por %p106_p2, %p34_p13  ;;  %p404_p5 = scmp.lt.s32.totalorder %s575_s15, 2 }
  0x15   : > { %s149_s6 = sand.u32 1, %s571_s14   ;;  %s373_s7 = sshll.u32 %s575_s15, 4 }
  0x16   : > { %p36_p7 = por %p35_p0, %p34_p13  ;;  %s359_s8 = sshll.u32 %s149_s6, 4 }
  0x17   : > { %s158_s11 = scalar_lea.hbm %s753_s0, %s373_s7  ;;  %s153_s20 = scalar_lea.vmem [#allocation2], %s359_s8 }
  0x18   : > { %s159_s17 = sshll.u32 %s158_s11, 4  ;;  %s161_s21 = sshll.u32 %s153_s20, 4  ;;  %s160_s17 = int_to_ptr.hbm [resolvable:$true] %s159_s17  ;;  %s162_s21 = int_to_ptr.vmem [resolvable:$true] %s161_s21 }
  0x19   : > { %p681_p9 = pnand %p404_p5, %p36_p7  ;;  %s150_s24 = scalar_lea.sflag [#allocation3], %s149_s6 }
  0x1a   : > { %s475_s25 = sshra.s32 %s160_s17, 4  ;;  %s482_s8 = scalar_lea.hbm %s753_s0, 32  ;;  %s476_s25 = int_to_ptr.hbm [resolvable:$true] %s475_s25 }
  0x1b   : > { %s477_s29 = scalar_lea.hbm %s476_s25, 16  ;;  %p479_p10 = pneg %p681_p9 }
  0x1c   : > { %p478_p2 = scmp.ne.s32.totalorder %s476_s25, %s477_s29  ;;  %p483_p0 = scmp.lt.s32.totalorder %s476_s25, %s753_s0 }
  0x1d   : > { %p484_p5 = scmp.lt.s32.totalorder %s482_s8, %s477_s29 }
  0x1e   : > { %p480_p12 = pnand %p479_p10, %p478_p2 }
  0x1f   : > { %p485_p7 = por %p484_p5, %p483_p0 }
  0x20   : > { %p481_p13 = pneg %p480_p12 }
  0x22   : > { %p486_p11 = pnand %p485_p7, %p481_p13 }
  0x24   : > { %489 = shalt.err (!%p486_p11)
}
  0x25   : > { %398 = dma.hbm_to_vmem [thread:$0]  (!%p681_p9), %s160_s17, 256, %s162_s21, %s150_s24, %s578_s27, %s578_s27, %s579_s28  }
  0x26   : > { %173 = sbr.rel (%p645_p8) target bundleno = 195 (0xc3), region = 32  ;;  %s701_s6 = sand.u32 (!%p645_p8), 1, %s567_s13  }
  0x27   : > { %s363_s11 = sshll.u32 (!%p645_p8), %s701_s6, 4  ;;  %s176_s20 = scalar_lea.sflag (!%p645_p8), [#allocation3], %s701_s6 }
  0x28   : > { %s179_s25 = scalar_lea.vmem (!%p645_p8), [#allocation2], %s363_s11 }
  0x2b   : > { %550 = dma.done.wait (%p632_p4), %s176_s20, 256  }
  0x2c   : > { %552 = vsyncadd (%p632_p4), %s176_s20, 4294967040 }
  0x2d   : > { %554 = dma.done.wait (%p41_p1), [#allocation6], 1024  }
  0x2e   : > { %556 = vsyncadd (%p41_p1), [#allocation6], 4294966272  ;;  %v219_v0 = vld [vmem:[#allocation5 + $0x38] sm:$0xff]  ;;  %v218_v1 = vld [vmem:[#allocation5 + $0x30] sm:$0xff]  ;;  %vm224_vm0 = vcmask 523264   ;;  %s374_s18 = sshll.u32 %s623_s16, 4 }
  0x2f   : > { %239 = vmatpush.msra.mxu0 %v219_v0  ;;  %375 = vmatpush.msra.mxu1 %v219_v0  ;;  %v217_v2 = vld [vmem:[#allocation5 + $0x28] sm:$0xff]  ;;  %v216_v3 = vld [vmem:[#allocation5 + $0x20] sm:$0xff]  ;;  %v215_v4 = vld [vmem:[#allocation5 + $0x18] sm:$0xff]  ;;  %s268_s28 = scalar_lea.hbm %s756_s3, %s374_s18  ;;  %s207_s22 = scalar_lea.vmem [#allocation7], %s363_s11 }
  0x30   : > { %v214_v5 = vld [vmem:[#allocation5 + $0x10] sm:$0xff]  ;;  %v213_v6 = vld [vmem:[#allocation5 + $0x8] sm:$0xff]  ;;  %v212_v7 = vld [vmem:[#allocation5] sm:$0xff]  ;;  %s269_s24 = sshll.u32 %s207_s22, 4  ;;  %s271_s29 = sshll.u32 %s268_s28, 4  ;;  %s270_s24 = int_to_ptr.vmem [resolvable:$true] %s269_s24  ;;  %s272_s29 = int_to_ptr.hbm [resolvable:$true] %s271_s29 }
  0x31   : > { %240 = vmatpush.msra.mxu0 %v218_v1  ;;  %376 = vmatpush.msra.mxu1 %v218_v1  ;;  %v210_v8 = vld [vmem:[%s179_s25] sm:$0xff]  ;;  %v211_v9 = vld [vmem:[%s179_s25 + $0x8] sm:$0xff]  ;;  %s257_s16 = scalar_lea.sflag [#allocation4], %s701_s6  ;;  %s519_s30 = sshra.s32 %s272_s29, 4  ;;  %s520_s30 = int_to_ptr.hbm [resolvable:$true] %s519_s30 }
  0x32   : > { %v444_v10 = vld [vmem:[%s755_s2] ss:$0 sm:$0xff]  ;;  %s521_s7 = scalar_lea.hbm %s520_s30, 16  ;;  %s525_s10 = scalar_lea.hbm %s756_s3, 32 }
  0x33   : > { %241 = vmatpush.msra.mxu0 %v217_v2  ;;  %377 = vmatpush.msra.mxu1 %v217_v2  ;;  %p522_p1 = scmp.ne.s32.totalorder %s520_s30, %s521_s7  ;;  %p526_p11 = scmp.lt.s32.totalorder %s520_s30, %s756_s3 }
  0x34   : > { %p527_p9 = scmp.lt.s32.totalorder %s525_s10, %s521_s7 }
  0x35   : > { %242 = vmatpush.msra.mxu0 %v216_v3  ;;  %378 = vmatpush.msra.mxu1 %v216_v3  ;;  %p523_p4 = pnand %p522_p1, %p671_p3 }
  0x36   : > { %p528_p2 = por %p527_p9, %p526_p11 }
  0x37   : > { %243 = vmatpush.msra.mxu0 %v215_v4  ;;  %379 = vmatpush.msra.mxu1 %v215_v4  ;;  %p524_p8 = pneg %p523_p4 }
  0x39   : > { %244 = vmatpush.msra.mxu0 %v214_v5  ;;  %380 = vmatpush.msra.mxu1 %v214_v5  ;;  %p529_p10 = pnand %p528_p2, %p524_p8 }
  0x3b   : > { %245 = vmatpush.msra.mxu0 %v213_v6  ;;  %381 = vmatpush.msra.mxu1 %v213_v6 }
  0x3d   : > { %246 = vmatpush.msra.mxu0 %v212_v7  ;;  %382 = vmatpush.msra.mxu1 %v212_v7 }
  0x3e   : > { %366 = vmatmul.msk.f32.vlgmr.msra.gmra.mxu0 %vm224_vm0, %v210_v8  ;;  %367 = vmatmul.msk.f32.vlgmr.msra.gmra.mxu1 %vm224_vm0, %v211_v9 }
  0xbb   : > { %v248_v11 = vpop.f32.mrf.mxu0  ;;  %v251_v12 = vpop.f32.mrf.mxu1 }
  0xbc   : > { %v249_v13 = vadd.f32 %v444_v10, %v248_v11  ;;  %v252_v14 = vadd.f32 %v444_v10, %v251_v12 }
  0xbe   : > { %254 = vst [vmem:[%s207_s22] sm:$0xff] %v249_v13 }
  0xbf   : > { %255 = vst [vmem:[%s207_s22 + $0x8] sm:$0xff] %v252_v14 }
  0xc0   : > { %532 = shalt.err (!%p529_p10)
}
  0xc1   : > { %s580_s6 = smov 128   ;;  %s581_s25 = smov 8  }
  0xc2   : > { %389 = dma.vmem_to_hbm [thread:$0]  (%p671_p3), %s270_s24, 256, %s272_s29, %s257_s16, %s580_s6, %s580_s6, %s581_s25  }
  0xc3 PF: > { %s286_s18 = sand.u32 1, %s563_s12   ;;  %p762_p12 = scmp.ge.s32.totalorder %s575_s15, 2 }
  0xc4   : > { %s287_s23 = scalar_lea.sflag [#allocation4], %s286_s18 }
  0xc5   : > { %p400_p13 = pnand %p762_p12, %p637_p6 }
  0xc7   : > { %p401_p0 = pneg %p400_p13 }
  0xc9   : > { %558 = dma.done.wait (%p401_p0), %s287_s23, 256  }
  0xca   : > { %560 = vsyncadd (%p401_p0), %s287_s23, 4294967040  ;;  %p17_p5 = scmp.ge.s32.totalorder %s655_s26, 4   ;;  %s763_s12 = smov %s567_s13 }
  0xcb   : > { %s764_s13 = smov %s571_s14  ;;  %s765_s14 = smov %s667_s4 }
  0xcc   : > { %s766_s15 = smov %s655_s26  ;;  %19 = sbr.rel (!%p17_p5) target bundleno = 6 (0x6), region = 81 }
  0xd1   :  { %293 = vsyncpa [#allocation3], 1 }
  0xd2   :  { %295 = vsyncpa [#allocation3 + $0x1], 1 }
  0xd3   :  { %296 = vsyncpa [#allocation6], 1 }
  0xd4   :  { %297 = vsyncpa [#allocation4], 1 }
  0xd5   :  { %299 = vsyncpa [#allocation4 + $0x1], 1 }

</bundles_post_ra>
